<compile_context>
chip_gen: v6e
topology: v6e:2x2x1
jax: 0.10.0
libtpu: 0.0.40
codegen_flags: <defaults>
</compile_context>

<pallas_src>
import functools

import jax
import jax.numpy as jnp
from jax.experimental import pallas as pl
from jax.experimental.pallas import tpu as pltpu


# ----------------------------------------------------------------------------
# Fused kernel: out = SiLU(x @ W1 + b1) @ W2 + b2   for one tile of rows.
# ----------------------------------------------------------------------------
def _embed_fc_kernel(x_ref, w1_ref, b1_ref, w2_ref, b2_ref, o_ref):
    # x_ref : (TM, Din)     (bf16 or f32)
    # w1_ref: (Din, Demb)   (bf16 or f32)    b1_ref: (1, Demb) f32
    # w2_ref: (Demb, Demb)  (bf16 or f32)    b2_ref: (1, Demb) f32
    # o_ref : (TM, Demb)    (original input dtype)
    h = jnp.dot(x_ref[...], w1_ref[...], preferred_element_type=jnp.float32)
    h = h + b1_ref[...]
    h = h * jax.nn.sigmoid(h)                 # SiLU in f32 (EUP sigmoid + VPU mul)
    y = jnp.dot(h.astype(w2_ref.dtype), w2_ref[...],
                preferred_element_type=jnp.float32)
    y = y + b2_ref[...]
    o_ref[...] = y.astype(o_ref.dtype)


# ----------------------------------------------------------------------------
# Row-tile selection: big tiles (amortize ~0.35us/step overhead), but never a
# single grid step for large M (v7x megacore needs >= 2 steps to use both TCs).
# ----------------------------------------------------------------------------
def _choose_tm(m: int, sublane: int) -> int:
    if m <= sublane:
        return m                               # block == full dim (always legal)
    tm = 1024                                  # sweet spot of measured tile curve
    while tm > 512 and pl.cdiv(m, tm) < 2:     # keep >= 2 steps when M is large
        tm //= 2
    return min(tm, pl.cdiv(m, sublane) * sublane)


# ----------------------------------------------------------------------------
# Wrapper: flatten leading dims (PyTorch x.view(-1, input_dim)), tile rows.
# ----------------------------------------------------------------------------
def embed_fc_forward(params, x, *, mxu_dtype=jnp.bfloat16):
    w1, b1, w2, b2 = params["w1"], params["b1"], params["w2"], params["b2"]
    din, demb = w1.shape
    xf = x.reshape(-1, din)                    # PyTorch: x.view(-1, input_dim)
    m = xf.shape[0]

    if mxu_dtype is not None:                  # feed the MXU bf16 (v6e/v7x native)
        xf = xf.astype(mxu_dtype)
        w1 = w1.astype(mxu_dtype)
        w2 = w2.astype(mxu_dtype)

    sublane = 16 if xf.dtype == jnp.bfloat16 else 8
    tm = _choose_tm(m, sublane)
    grid = (pl.cdiv(m, tm),)                   # ragged tail handled by Pallas

    return pl.pallas_call(
        _embed_fc_kernel,
        grid=grid,
        out_shape=jax.ShapeDtypeStruct((m, demb), x.dtype),
        in_specs=[
            pl.BlockSpec((tm, din), lambda i: (i, 0)),      # x rows: pipelined
            pl.BlockSpec((din, demb), lambda i: (0, 0)),    # W1: VMEM-resident
            pl.BlockSpec((1, demb), lambda i: (0, 0)),      # b1 (f32)
            pl.BlockSpec((demb, demb), lambda i: (0, 0)),   # W2: VMEM-resident
            pl.BlockSpec((1, demb), lambda i: (0, 0)),      # b2 (f32)
        ],
        out_specs=pl.BlockSpec((tm, demb), lambda i: (i, 0)),
        compiler_params=pltpu.CompilerParams(
            dimension_semantics=("parallel",)),
    )(
        xf,
        w1,
        b1.reshape(1, demb).astype(jnp.float32),
        w2,
        b2.reshape(1, demb).astype(jnp.float32),
    )


# ----------------------------------------------------------------------------
# Pure-JAX reference for correctness.
# ----------------------------------------------------------------------------
def reference_forward(params, x):
    din = params["w1"].shape[0]
    xf = x.reshape(-1, din).astype(jnp.float32)
    h = xf @ params["w1"] + params["b1"]
    h = h * jax.nn.sigmoid(h)
    return h @ params["w2"] + params["b2"]


if __name__ == "__main__":
    key = jax.random.PRNGKey(0)
    k1, k2, k3, k4, k5 = jax.random.split(key, 5)

    input_dim, emb_dim = 32, 128
    # EmbedFC.forward flattens all leading dims via x.view(-1, input_dim):
    # (2, 4, 32) -> M = 8 rows.
    x = jax.random.normal(k1, (2, 4, input_dim), jnp.float32)

    # Deterministic params ((in, out) layout; equivalent to PyTorch's (out, in)
    # weights up to transpose since we initialize them ourselves).
    params = dict(
        w1=0.1 * jax.random.normal(k2, (input_dim, emb_dim), jnp.float32),
        b1=0.1 * jax.random.normal(k3, (emb_dim,), jnp.float32),
        w2=0.1 * jax.random.normal(k4, (emb_dim, emb_dim), jnp.float32),
        b2=0.1 * jax.random.normal(k5, (emb_dim,), jnp.float32),
    )

    ref = reference_forward(params, x)

    # 1) f32 MXU path: tight numerical check.
    out_f32 = jax.block_until_ready(
        jax.jit(functools.partial(embed_fc_forward, params, mxu_dtype=None))(x))
    assert out_f32.shape == (2 * 4, emb_dim), out_f32.shape
    err32 = float(jnp.max(jnp.abs(out_f32 - ref)))
    assert jnp.allclose(out_f32, ref, rtol=1e-4, atol=1e-4), f"f32 err {err32}"

    # 2) bf16-MXU path (production default): looser tolerance for bf16 operands.
    out_bf = jax.block_until_ready(
        jax.jit(functools.partial(embed_fc_forward, params))(x))
    errbf = float(jnp.max(jnp.abs(out_bf - ref)))
    assert jnp.allclose(out_bf, ref, rtol=2e-2, atol=2e-2), f"bf16 err {errbf}"

    # 3) Multi-block + ragged tail path: M = 6*347 = 2082 rows -> grid=(3,),
    #    last block partially filled (no pad / slice round trip).
    xl = jax.random.normal(k1, (6, 347, input_dim), jnp.float32)
    refl = reference_forward(params, xl)
    out_l = jax.block_until_ready(
        jax.jit(functools.partial(embed_fc_forward, params))(xl))
    assert out_l.shape == (6 * 347, emb_dim), out_l.shape
    errl = float(jnp.max(jnp.abs(out_l - refl)))
    assert jnp.allclose(out_l, refl, rtol=2e-2, atol=2e-2), f"large err {errl}"

    print("KERNEL_OK")
</pallas_src>

<mosaic_0001>
module attributes {stable_mosaic.version = 11 : i64} {
  func.func @_embed_fc_kernel(%arg0: i32, %arg1: memref<8x32xf32, #tpu.memory_space<vmem>>, %arg2: memref<32x128xf32, #tpu.memory_space<vmem>>, %arg3: memref<1x128xf32, #tpu.memory_space<vmem>>, %arg4: memref<128x128xf32, #tpu.memory_space<vmem>>, %arg5: memref<1x128xf32, #tpu.memory_space<vmem>>, %arg6: memref<8x128xf32, #tpu.memory_space<vmem>>) attributes {dimension_semantics = [#tpu.dimension_semantics<parallel>], iteration_bounds = array<i64: 1>, scalar_prefetch = 0 : i64, scratch_operands = 0 : i64, tpu.core_type = #tpu.core_type<tc>, window_params = [{transform_indices = @transform_0, window_bounds = array<i64: 8, 32>}, {pipeline_mode = #tpu.pipeline_mode<synchronous>, transform_indices = @transform_1, window_bounds = array<i64: 32, 128>}, {pipeline_mode = #tpu.pipeline_mode<synchronous>, transform_indices = @transform_2, window_bounds = array<i64: 1, 128>}, {pipeline_mode = #tpu.pipeline_mode<synchronous>, transform_indices = @transform_3, window_bounds = array<i64: 128, 128>}, {pipeline_mode = #tpu.pipeline_mode<synchronous>, transform_indices = @transform_4, window_bounds = array<i64: 1, 128>}, {transform_indices = @transform_5, window_bounds = array<i64: 8, 128>}]} {
    %c0 = arith.constant 0 : index
    %c0_0 = arith.constant 0 : index
    %0 = vector.load %arg1[%c0, %c0_0] : memref<8x32xf32, #tpu.memory_space<vmem>>, vector<8x32xf32>
    %c0_1 = arith.constant 0 : index
    %c0_2 = arith.constant 0 : index
    %1 = vector.load %arg2[%c0_1, %c0_2] : memref<32x128xf32, #tpu.memory_space<vmem>>, vector<32x128xf32>
    %cst = arith.constant dense<0.000000e+00> : vector<8x128xf32>
    %2 = tpu.matmul %0, %1, %cst {dimension_numbers = #tpu.dot_dimension_numbers<[1], [0], [0], [1], [0, 0, 1, 1], [], []>} : vector<8x32xf32>, vector<32x128xf32>, vector<8x128xf32> -> vector<8x128xf32>
    %c0_3 = arith.constant 0 : index
    %c0_4 = arith.constant 0 : index
    %3 = vector.load %arg3[%c0_3, %c0_4] : memref<1x128xf32, #tpu.memory_space<vmem>>, vector<1x128xf32>
    %4 = vector.broadcast %3 : vector<1x128xf32> to vector<8x128xf32>
    %5 = arith.addf %2, %4 : vector<8x128xf32>
    %6 = arith.negf %5 : vector<8x128xf32>
    %7 = math.exp %6 : vector<8x128xf32>
    %cst_5 = arith.constant 1.000000e+00 : f32
    %8 = vector.broadcast %cst_5 : f32 to vector<8x128xf32>
    %9 = arith.addf %8, %7 : vector<8x128xf32>
    %10 = arith.divf %8, %9 : vector<8x128xf32>
    %11 = arith.mulf %5, %10 : vector<8x128xf32>
    %c0_6 = arith.constant 0 : index
    %c0_7 = arith.constant 0 : index
    %12 = vector.load %arg4[%c0_6, %c0_7] : memref<128x128xf32, #tpu.memory_space<vmem>>, vector<128x128xf32>
    %cst_8 = arith.constant dense<0.000000e+00> : vector<8x128xf32>
    %13 = tpu.matmul %11, %12, %cst_8 {dimension_numbers = #tpu.dot_dimension_numbers<[1], [0], [0], [1], [0, 0, 1, 1], [], []>} : vector<8x128xf32>, vector<128x128xf32>, vector<8x128xf32> -> vector<8x128xf32>
    %c0_9 = arith.constant 0 : index
    %c0_10 = arith.constant 0 : index
    %14 = vector.load %arg5[%c0_9, %c0_10] : memref<1x128xf32, #tpu.memory_space<vmem>>, vector<1x128xf32>
    %15 = vector.broadcast %14 : vector<1x128xf32> to vector<8x128xf32>
    %16 = arith.addf %13, %15 : vector<8x128xf32>
    %c0_11 = arith.constant 0 : index
    %c0_12 = arith.constant 0 : index
    %17 = vector.load %arg6[%c0_11, %c0_12] : memref<8x128xf32, #tpu.memory_space<vmem>>, vector<8x128xf32>
    tpu.vector_store %arg6[%c0_11, %c0_12], %16 {strides = array<i32>} : memref<8x128xf32, #tpu.memory_space<vmem>>, vector<8x128xf32>,
    return
  }
  func.func @transform_0(%arg0: i32) -> (i32, i32) {
    %c0_i32 = arith.constant 0 : i32
    %c0_i32_0 = arith.constant 0 : i32
    return %arg0, %c0_i32 : i32, i32
  }
  func.func @transform_1(%arg0: i32) -> (i32, i32) {
    %c0_i32 = arith.constant 0 : i32
    %c0_i32_0 = arith.constant 0 : i32
    %c0_i32_1 = arith.constant 0 : i32
    return %c0_i32, %c0_i32_0 : i32, i32
  }
  func.func @transform_2(%arg0: i32) -> (i32, i32) {
    %c0_i32 = arith.constant 0 : i32
    %c0_i32_0 = arith.constant 0 : i32
    %c0_i32_1 = arith.constant 0 : i32
    return %c0_i32, %c0_i32_0 : i32, i32
  }
  func.func @transform_3(%arg0: i32) -> (i32, i32) {
    %c0_i32 = arith.constant 0 : i32
    %c0_i32_0 = arith.constant 0 : i32
    %c0_i32_1 = arith.constant 0 : i32
    return %c0_i32, %c0_i32_0 : i32, i32
  }
  func.func @transform_4(%arg0: i32) -> (i32, i32) {
    %c0_i32 = arith.constant 0 : i32
    %c0_i32_0 = arith.constant 0 : i32
    %c0_i32_1 = arith.constant 0 : i32
    return %c0_i32, %c0_i32_0 : i32, i32
  }
  func.func @transform_5(%arg0: i32) -> (i32, i32) {
    %c0_i32 = arith.constant 0 : i32
    %c0_i32_0 = arith.constant 0 : i32
    return %arg0, %c0_i32 : i32, i32
  }
}

</mosaic_0001>

<bundles_post_ra>
// kernel: embed_fc_forward.1
= control target key start
LH: loop header
LB: loop body
LE: loop exit
PB: predicated region body
PF: predicated region fallthrough
CT: control target
= control target key end

     0   :  { %10 = vsyncpa [#allocation3], 0  ;;  %s511_s0 = inlined_call_operand.hbm [shape: f32[8,32], index: 0, kind: input, shape index: {}]   ;;  %s512_s1 = inlined_call_operand.hbm [shape: f32[32,128], index: 1, kind: input, shape index: {}]   ;;  %s513_s2 = inlined_call_operand.vmem [shape: f32[1,128], index: 2, kind: input, shape index: {}]   ;;  %s514_s3 = inlined_call_operand.hbm [shape: f32[128,128], index: 3, kind: input, shape index: {}]   ;;  %s515_s4 = inlined_call_operand.vmem [shape: f32[1,128], index: 4, kind: input, shape index: {}]   ;;  %s516_s5 = inlined_call_operand.hbm [shape: f32[8,128], index: 5, kind: output, shape index: {}]  }
   0x1   :  { %11 = vsyncpa [#allocation6], 0 }
   0x2   :  { %12 = vsyncpa [#allocation4], 0  ;;  %s433_s18 = smov [#allocation5]  }
   0x3   :  { %s28_s19 = sshll.u32 %s433_s18, 4  ;;  %s29_s19 = int_to_ptr.vmem [resolvable:$true] %s28_s19 }
   0x4   :  { %s355_s20 = scalar_lea.vmem %s29_s19, 512  ;;  %p360_p1 = scmp.lt.s32.totalorder %s29_s19, %s29_s19 }
   0x5   :  { %p356_p0 = scmp.ne.s32.totalorder %s29_s19, %s355_s20  ;;  %p361_p2 = scmp.lt.s32.totalorder %s355_s20, %s355_s20 }
   0x7   :  { %p362_p3 = por %p361_p2, %p360_p1 }
   0x9   :  { %p363_p4 = pnand %p362_p3, %p356_p0 }
   0xb   :  { %366 = shalt.err (!%p363_p4)
}
   0xc   :  { %s434_s21 = smov 128   ;;  %s435_s22 = smov 8  }
   0xd   :  { %34 = dma.hbm_to_vmem [thread:$0]  %s512_s1, 512, %s29_s19, [#allocation6], %s434_s21, %s434_s21, %s435_s22  }
   0xe   :  { %s436_s25 = smov [#allocation2]   ;;  %s437_s27 = smov [#allocation7]  }
   0xf   :  { %s19_s26 = sshll.u32 %s436_s25, 4  ;;  %s42_s28 = sshll.u32 %s437_s27, 4  ;;  %s20_s26 = int_to_ptr.vmem [resolvable:$true] %s19_s26  ;;  %s43_s28 = int_to_ptr.vmem [resolvable:$true] %s42_s28 }
  0x10   :  { %s375_s29 = scalar_lea.vmem %s20_s26, 128  ;;  %p380_p6 = scmp.lt.s32.totalorder %s20_s26, %s20_s26 }
  0x11   :  { %p376_p5 = scmp.ne.s32.totalorder %s20_s26, %s375_s29  ;;  %p381_p7 = scmp.lt.s32.totalorder %s375_s29, %s375_s29 }
  0x13   :  { %p382_p8 = por %p381_p7, %p380_p6 }
  0x15   :  { %p383_p9 = pnand %p382_p8, %p376_p5 }
  0x17   :  { %386 = shalt.err (!%p383_p9)
}
  0x18   :  { %22 = dma.hbm_to_vmem [thread:$0]  %s511_s0, 128, %s20_s26, [#allocation3]  }
  0x19   :  { %s395_s7 = scalar_lea.vmem %s43_s28, 2048  ;;  %p400_p11 = scmp.lt.s32.totalorder %s43_s28, %s43_s28 }
  0x1a   :  { %p396_p10 = scmp.ne.s32.totalorder %s43_s28, %s395_s7  ;;  %p401_p12 = scmp.lt.s32.totalorder %s395_s7, %s395_s7 }
  0x1c   :  { %p402_p13 = por %p401_p12, %p400_p11 }
  0x1e   :  { %p403_p0 = pnand %p402_p13, %p396_p10 }
  0x20   :  { %406 = shalt.err (!%p403_p0)
}
  0x21   :  { %48 = dma.hbm_to_vmem [thread:$0]  %s514_s3, 2048, %s43_s28, [#allocation6], %s434_s21, %s434_s21, %s435_s22  }
  0x22   :  { %427 = dma.done.wait [#allocation3], 128  }
  0x23   :  { %428 = vsyncadd [#allocation3], 4294967168 }
  0x24   :  { %429 = dma.done.wait [#allocation6], 2560  }
  0x25   :  { %430 = vsyncadd [#allocation6], 4294964736  ;;  %v438_v0 = vmov 0.0   ;;  %vm439_vm0 = vmmov 0   ;;  %v64_v1 = vld [vmem:[#allocation5 + $0x18] sm:$0xff]  ;;  %v63_v2 = vld [vmem:[#allocation5 + $0x10] sm:$0xff] }
  0x26   :  { %289 = vmatprep.subr.mxu0 %v438_v0  ;;  %297 = vmatprep.mubr.msk.f32.mxu0 %vm439_vm0, %v438_v0  ;;  %v62_v3 = vld [vmem:[#allocation5 + $0x8] sm:$0xff]  ;;  %v61_v4 = vld [vmem:[#allocation5] sm:$0xff]  ;;  %v60_v5 = vld [vmem:[#allocation2] sm:$0xff]  ;;  %vm72_vm1 = vcmask 261120   ;;  %s440_s11 = smov [#allocation8]  }
  0x27   :  { %300 = vmatprep.subr.mxu1 %v438_v0  ;;  %332 = vmatprep.mubr.msk.f32.mxu1 %vm439_vm0, %v438_v0  ;;  %v168_v6 = vld [vmem:[#allocation7 + $0x78] sm:$0xff]  ;;  %v167_v7 = vld [vmem:[#allocation7 + $0x70] sm:$0xff]  ;;  %v166_v8 = vld [vmem:[#allocation7 + $0x68] sm:$0xff]  ;;  %s253_s12 = sshll.u32 %s440_s11, 4  ;;  %s254_s12 = int_to_ptr.vmem [resolvable:$true] %s253_s12 }
  0x28   :  { %290 = vmatpush3.msra.mxu0 %v64_v1  ;;  %301 = vmatpush3.msra.mxu1 %v168_v6  ;;  %v165_v9 = vld [vmem:[#allocation7 + $0x60] sm:$0xff]  ;;  %v164_v10 = vld [vmem:[#allocation7 + $0x58] sm:$0xff]  ;;  %v163_v11 = vld [vmem:[#allocation7 + $0x50] sm:$0xff]  ;;  %p412_p2 = scmp.lt.s32.totalorder %s254_s12, %s254_s12 }
  0x29   :  { %291 = vmatprep.subr.mxu0 %v438_v0  ;;  %302 = vmatprep.subr.mxu1 %v438_v0  ;;  %v162_v12 = vld [vmem:[#allocation7 + $0x48] sm:$0xff]  ;;  %v161_v13 = vld [vmem:[#allocation7 + $0x40] sm:$0xff]  ;;  %v160_v14 = vld [vmem:[#allocation7 + $0x38] sm:$0xff] }
  0x2a   :  { %292 = vmatpush3.msra.mxu0 %v63_v2  ;;  %303 = vmatpush3.msra.mxu1 %v167_v7  ;;  %v159_v15 = vld [vmem:[#allocation7 + $0x30] sm:$0xff]  ;;  %v158_v16 = vld [vmem:[#allocation7 + $0x28] sm:$0xff]  ;;  %v157_v17 = vld [vmem:[#allocation7 + $0x20] sm:$0xff] }
  0x2b   :  { %293 = vmatprep.subr.mxu0 %v438_v0  ;;  %304 = vmatprep.subr.mxu1 %v438_v0  ;;  %v156_v18 = vld [vmem:[#allocation7 + $0x18] sm:$0xff]  ;;  %v155_v19 = vld [vmem:[#allocation7 + $0x10] sm:$0xff]  ;;  %v154_v20 = vld [vmem:[#allocation7 + $0x8] sm:$0xff] }
  0x2c   :  { %294 = vmatpush3.msra.mxu0 %v62_v3  ;;  %305 = vmatpush3.msra.mxu1 %v166_v8  ;;  %v153_v21 = vld [vmem:[#allocation7] sm:$0xff]  ;;  %v263_v22 = vld [vmem:[%s513_s2] ss:$0 sm:$0xff]  ;;  %s407_s2 = scalar_lea.vmem %s254_s12, 128 }
  0x2d   :  { %295 = vmatprep.subr.mxu0 %v438_v0  ;;  %306 = vmatprep.subr.mxu1 %v438_v0  ;;  %v266_v31 = vld [vmem:[%s515_s4] ss:$0 sm:$0xff]  ;;  %p408_p1 = scmp.ne.s32.totalorder %s254_s12, %s407_s2  ;;  %p413_p3 = scmp.lt.s32.totalorder %s407_s2, %s407_s2 }
  0x2e   :  { %296 = vmatpush3.msra.mxu0 %v61_v4  ;;  %307 = vmatpush3.msra.mxu1 %v165_v9 }
  0x2f   :  { %298 = vmatmul.mubr.msk.f32.vlgmr.msra.gmra.mxu0 %vm72_vm1, %v60_v5  ;;  %308 = vmatprep.subr.mxu1 %v438_v0  ;;  %p414_p4 = por %p413_p3, %p412_p2 }
  0x30   :  { %309 = vmatpush3.msra.mxu1 %v164_v10 }
  0x31   :  { %310 = vmatprep.subr.mxu1 %v438_v0  ;;  %p415_p5 = pnand %p414_p4, %p408_p1 }
  0x32   :  { %311 = vmatpush3.msra.mxu1 %v163_v11 }
  0x33   :  { %312 = vmatprep.subr.mxu1 %v438_v0 }
  0x34   :  { %313 = vmatpush3.msra.mxu1 %v162_v12 }
  0x35   :  { %314 = vmatprep.subr.mxu1 %v438_v0 }
  0x36   :  { %315 = vmatpush3.msra.mxu1 %v161_v13 }
  0x37   :  { %316 = vmatprep.subr.mxu1 %v438_v0 }
  0x38   :  { %317 = vmatpush3.msra.mxu1 %v160_v14 }
  0x39   :  { %318 = vmatprep.subr.mxu1 %v438_v0 }
  0x3a   :  { %319 = vmatpush3.msra.mxu1 %v159_v15 }
  0x3b   :  { %320 = vmatprep.subr.mxu1 %v438_v0 }
  0x3c   :  { %321 = vmatpush3.msra.mxu1 %v158_v16 }
  0x3d   :  { %322 = vmatprep.subr.mxu1 %v438_v0 }
  0x3e   :  { %323 = vmatpush3.msra.mxu1 %v157_v17 }
  0x3f   :  { %324 = vmatprep.subr.mxu1 %v438_v0 }
  0x40   :  { %325 = vmatpush3.msra.mxu1 %v156_v18 }
  0x41   :  { %326 = vmatprep.subr.mxu1 %v438_v0 }
  0x42   :  { %327 = vmatpush3.msra.mxu1 %v155_v19 }
  0x43   :  { %328 = vmatprep.subr.mxu1 %v438_v0 }
  0x44   :  { %329 = vmatpush3.msra.mxu1 %v154_v20 }
  0x45   :  { %330 = vmatprep.subr.mxu1 %v438_v0 }
  0x46   :  { %331 = vmatpush3.msra.mxu1 %v153_v21 }
  0xef   :  { %v142_v23 = vpop.f32.mrf.mxu0 }
  0xf0   :  { %v143_v24 = vadd.f32 %v263_v22, %v142_v23 }
  0xf1   :  { %v299_v25 = vpop.f32.mrf.mxu0 }
  0xf2   :  { %v265_v26 = vmul.f32 -1.442695, %v143_v24 }
  0xf4   :  { %343 = vpow2.f32 %v265_v26 }
 0x101   :  { %v344_v27 = vpop.eup %343 }
 0x102   :  { %v149_v28 = vadd.f32 1.0, %v344_v27 }
 0x104   :  { %345 = vrcp.f32 %v149_v28 }
 0x111   :  { %v346_v29 = vpop.eup %345 }
 0x112   :  { %v152_v30 = vmul.f32 %v346_v29, %v143_v24 }
 0x114   :  { %333 = vmatmul.mubr.f32.vlgmr.msra.gmra.mxu1 %v152_v30 }
 0x1d4   :  { %v242_v32 = vpop.f32.mrf.mxu1 }
 0x1d5   :  { %v243_v33 = vadd.f32 %v266_v31, %v242_v32 }
 0x1d6   :  { %v334_v34 = vpop.f32.mrf.mxu1 }
 0x1d7   :  { %246 = vst [vmem:[#allocation8] sm:$0xff] %v243_v33 }
 0x1d8   :  { %418 = shalt.err (!%p415_p5)
}
 0x1d9   :  { %256 = dma.vmem_to_hbm [thread:$0]  %s254_s12, 128, %s516_s5, [#allocation4]  }
 0x1da   :  { %431 = dma.done.wait [#allocation4], 128  }
 0x1db   :  { %432 = vsyncadd [#allocation4], 4294967168 }
 0x1dc   :  { %260 = vsyncpa [#allocation3], 1 }
 0x1dd   :  { %261 = vsyncpa [#allocation6], 1 }
 0x1de   :  { %262 = vsyncpa [#allocation4], 1 }

</bundles_post_ra>
